<compile_context>
chip_gen: v7x
topology: tpu7x:2x2x1
jax: 0.10.0
libtpu: 0.0.40
codegen_flags: <defaults>
</compile_context>

<pallas_src>
import jax
import jax.numpy as jnp
from jax.experimental import pallas as pl
from jax.experimental.pallas import tpu as pltpu

_LANE = 128


def _round_up(n, m):
    return ((n + m - 1) // m) * m


def _pad2d(a, rows, cols):
    return jnp.pad(a, ((0, rows - a.shape[0]), (0, cols - a.shape[1])))


def prepare_params(params):
    """One-time weight prep: lane-pad everything and fuse the two latent heads.

    Done once at init (not per forward) so the per-call path only pads the
    activations.  Uses jnp.pad / concatenate (no scatter ops).
    """
    input_dim, hidden_dim = params["w1"].shape
    latent_dim = params["wm"].shape[1]

    in_pad = _round_up(input_dim, _LANE)
    hid_pad = _round_up(hidden_dim, _LANE)
    lat_pad = _round_up(latent_dim, _LANE)

    w1p = _pad2d(params["w1"], in_pad, hid_pad)
    b1p = _pad2d(params["b1"], 1, hid_pad)
    gp = _pad2d(params["gamma"], 1, hid_pad)
    bp = _pad2d(params["beta"], 1, hid_pad)

    # Fused heads: [ mean-head | log_var-head ] -> one (hid_pad, 2*lat_pad) matmul.
    w2p = jnp.concatenate(
        [_pad2d(params["wm"], hidden_dim, lat_pad),
         _pad2d(params["wv"], hidden_dim, lat_pad)], axis=1)
    w2p = jnp.pad(w2p, ((0, hid_pad - hidden_dim), (0, 0)))
    b2p = jnp.concatenate(
        [_pad2d(params["bm"], 1, lat_pad),
         _pad2d(params["bv"], 1, lat_pad)], axis=1)

    padded = dict(w1p=w1p, b1p=b1p, gp=gp, bp=bp, w2p=w2p, b2p=b2p)
    dims = dict(input_dim=input_dim, hidden_dim=hidden_dim, latent_dim=latent_dim,
                in_pad=in_pad, hid_pad=hid_pad, lat_pad=lat_pad)
    return padded, dims


def vae_forward(x, padded, dims, keep_mask, eps_noise, *, matmul_dtype=jnp.float32):
    """VAE encoder forward in one Pallas kernel.

    Args:
      x: (B, input_dim) f32 input.
      padded/dims: output of prepare_params (weights pre-padded / fused).
      keep_mask: (B, hidden_dim) dropout mask, values in {0, 1/(1-p)}.
      eps_noise: (B, latent_dim) ~ N(0, 1) reparameterization noise.
      matmul_dtype: operand dtype for the two MXU matmuls (f32 or bf16);
        accumulation is always f32.

    Returns (z_intrinsic, intrinsic_mean, intrinsic_log_var).
    """
    B = x.shape[0]
    assert B % 8 == 0, "batch must be a multiple of the f32 sublane tile (8)"

    in_pad = dims["in_pad"]
    hid_pad = dims["hid_pad"]
    lat_pad = dims["lat_pad"]
    latent_dim = dims["latent_dim"]
    out_cols = 3 * lat_pad                    # [ z | mean | log_var ]

    # Per-call activation padding only (weights were padded once at init).
    xp = _pad2d(x, B, in_pad)
    maskp = _pad2d(keep_mask, B, hid_pad)
    epsp = _pad2d(eps_noise, B, lat_pad)

    def kernel(x_ref, w1_ref, b1_ref, gamma_ref, beta_ref,
               w2_ref, b2_ref, mask_ref, eps_ref, out_ref):
        # --- encoder_z: Linear -> BatchNorm1d (train-mode stats) -> LeakyReLU -> Dropout
        h = jnp.dot(x_ref[...].astype(matmul_dtype),
                    w1_ref[...].astype(matmul_dtype),
                    preferred_element_type=jnp.float32) + b1_ref[...]

        # One-pass batch statistics (biased variance, as PyTorch BN in train mode).
        mu = jnp.mean(h, axis=0, keepdims=True)
        var = jnp.maximum(jnp.mean(h * h, axis=0, keepdims=True) - mu * mu, 0.0)

        # BN folded into a single FMA over the (B, hid_pad) tile.
        scale = gamma_ref[...] * jax.lax.rsqrt(var + 1e-5)
        shift = beta_ref[...] - mu * scale
        h = h * scale + shift

        h = jnp.where(h > 0, h, 0.01 * h)                      # LeakyReLU(0.01)
        h = h * mask_ref[...]                                  # Dropout (pre-scaled mask)

        # --- fused heads: single (hid_pad, 2*lat_pad) matmul -> [mean | log_var]
        heads = jnp.dot(h.astype(matmul_dtype),
                        w2_ref[...].astype(matmul_dtype),
                        preferred_element_type=jnp.float32) + b2_ref[...]
        m = heads[:, :lat_pad]
        lv = heads[:, lat_pad:]

        # --- reparameterize: z = mean + eps * exp(0.5 * log_var)
        z = m + eps_ref[...] * jnp.exp(0.5 * lv)

        # Lane-dense output slab: all stores are unmasked, 128-aligned.
        out_ref[:, 0 * lat_pad:1 * lat_pad] = z
        out_ref[:, 1 * lat_pad:2 * lat_pad] = m
        out_ref[:, 2 * lat_pad:3 * lat_pad] = lv

    vmem = pl.BlockSpec(memory_space=pltpu.MemorySpace.VMEM)

    flops = 2 * B * (in_pad * hid_pad + hid_pad * 2 * lat_pad)
    transcendentals = B * lat_pad + hid_pad        # exp for std + rsqrt for BN
    bytes_accessed = 4 * (xp.size + maskp.size + epsp.size + B * out_cols) \
        + 4 * sum(int(v.size) for v in padded.values())

    out = pl.pallas_call(
        kernel,
        out_shape=jax.ShapeDtypeStruct((B, out_cols), jnp.float32),
        in_specs=[vmem] * 9,
        out_specs=vmem,
        cost_estimate=pl.CostEstimate(flops=int(flops),
                                      transcendentals=int(transcendentals),
                                      bytes_accessed=int(bytes_accessed)),
        compiler_params=pltpu.CompilerParams(vmem_limit_bytes=32 * 1024 * 1024),
    )(xp, padded["w1p"], padded["b1p"], padded["gp"], padded["bp"],
      padded["w2p"], padded["b2p"], maskp, epsp)

    z = out[:, 0 * lat_pad:0 * lat_pad + latent_dim]
    mean = out[:, 1 * lat_pad:1 * lat_pad + latent_dim]
    log_var = out[:, 2 * lat_pad:2 * lat_pad + latent_dim]
    return z, mean, log_var


def init_params(key, input_dim, hidden_dim, latent_dim):
    ks = jax.random.split(key, 6)

    # Deterministic synthetic init (roughly PyTorch's uniform fan-in scaling).
    def lin(kw, kb, fan_in, fan_out):
        bound = 1.0 / jnp.sqrt(fan_in)
        w = jax.random.uniform(kw, (fan_in, fan_out), jnp.float32, -bound, bound)
        b = jax.random.uniform(kb, (1, fan_out), jnp.float32, -bound, bound)
        return w, b

    w1, b1 = lin(ks[0], ks[1], input_dim, hidden_dim)
    wm, bm = lin(ks[2], ks[3], hidden_dim, latent_dim)
    wv, bv = lin(ks[4], ks[5], hidden_dim, latent_dim)
    gamma = jnp.ones((1, hidden_dim), jnp.float32)
    beta = jnp.zeros((1, hidden_dim), jnp.float32)
    return dict(w1=w1, b1=b1, gamma=gamma, beta=beta, wm=wm, bm=bm, wv=wv, bv=bv)


if __name__ == "__main__":
    B, INPUT_DIM, HIDDEN_DIM, LATENT_DIM = 8, 32, 64, 16
    DROPOUT_P = 0.2

    root = jax.random.PRNGKey(0)
    k_x, k_p, k_eps, k_drop = jax.random.split(root, 4)

    x = jax.random.normal(k_x, (B, INPUT_DIM), jnp.float32)
    params = init_params(k_p, INPUT_DIM, HIDDEN_DIM, LATENT_DIM)

    # One-time weight prep (hoisted out of the per-call path).
    padded, dims = prepare_params(params)

    # Host-side RNG for dropout mask (pre-scaled by 1/(1-p)) and reparam noise.
    keep_prob = 1.0 - DROPOUT_P
    keep = (jax.random.uniform(k_drop, (B, HIDDEN_DIM), jnp.float32) < keep_prob)
    keep_mask = keep.astype(jnp.float32) * (1.0 / keep_prob)
    eps_noise = jax.random.normal(k_eps, (B, LATENT_DIM), jnp.float32)

    z, mean, log_var = vae_forward(x, padded, dims, keep_mask, eps_noise)
    jax.block_until_ready((z, mean, log_var))

    # --- Reference in plain JAX (same host-generated mask / eps; exact semantics).
    h_ref = x @ params["w1"] + params["b1"]
    mu = h_ref.mean(0, keepdims=True)
    var = ((h_ref - mu) ** 2).mean(0, keepdims=True)
    h_ref = (h_ref - mu) / jnp.sqrt(var + 1e-5) * params["gamma"] + params["beta"]
    h_ref = jnp.where(h_ref > 0, h_ref, 0.01 * h_ref) * keep_mask
    mean_ref = h_ref @ params["wm"] + params["bm"]
    lv_ref = h_ref @ params["wv"] + params["bv"]
    z_ref = mean_ref + eps_noise * jnp.exp(0.5 * lv_ref)

    assert jnp.allclose(mean, mean_ref, atol=1e-4, rtol=1e-4)
    assert jnp.allclose(log_var, lv_ref, atol=1e-4, rtol=1e-4)
    assert jnp.allclose(z, z_ref, atol=1e-4, rtol=1e-4)

    print("KERNEL_OK")
</pallas_src>

<mosaic_0001>
module attributes {stable_mosaic.version = 11 : i64} {
  func.func @kernel(%arg0: memref<8x128xf32, #tpu.memory_space<vmem>>, %arg1: memref<128x128xf32, #tpu.memory_space<vmem>>, %arg2: memref<1x128xf32, #tpu.memory_space<vmem>>, %arg3: memref<1x128xf32, #tpu.memory_space<vmem>>, %arg4: memref<1x128xf32, #tpu.memory_space<vmem>>, %arg5: memref<128x256xf32, #tpu.memory_space<vmem>>, %arg6: memref<1x256xf32, #tpu.memory_space<vmem>>, %arg7: memref<8x128xf32, #tpu.memory_space<vmem>>, %arg8: memref<8x128xf32, #tpu.memory_space<vmem>>, %arg9: memref<8x384xf32, #tpu.memory_space<vmem>>) attributes {dimension_semantics = [], scalar_prefetch = 0 : i64, scratch_operands = 0 : i64, tpu.core_type = #tpu.core_type<tc>} {
    %c0 = arith.constant 0 : index
    %c0_0 = arith.constant 0 : index
    %0 = vector.load %arg0[%c0, %c0_0] : memref<8x128xf32, #tpu.memory_space<vmem>>, vector<8x128xf32>
    %c0_1 = arith.constant 0 : index
    %c0_2 = arith.constant 0 : index
    %1 = vector.load %arg1[%c0_1, %c0_2] : memref<128x128xf32, #tpu.memory_space<vmem>>, vector<128x128xf32>
    %cst = arith.constant dense<0.000000e+00> : vector<8x128xf32>
    %2 = tpu.matmul %0, %1, %cst {dimension_numbers = #tpu.dot_dimension_numbers<[1], [0], [0], [1], [0, 0, 1, 1], [], []>} : vector<8x128xf32>, vector<128x128xf32>, vector<8x128xf32> -> vector<8x128xf32>
    %c0_3 = arith.constant 0 : index
    %c0_4 = arith.constant 0 : index
    %3 = vector.load %arg2[%c0_3, %c0_4] : memref<1x128xf32, #tpu.memory_space<vmem>>, vector<1x128xf32>
    %4 = vector.broadcast %3 : vector<1x128xf32> to vector<8x128xf32>
    %5 = arith.addf %2, %4 : vector<8x128xf32>
    %cst_5 = arith.constant dense<0.000000e+00> : vector<128xf32>
    %6 = vector.multi_reduction <add>, %5, %cst_5 [0] : vector<8x128xf32> to vector<128xf32>
    %7 = vector.shape_cast %6 : vector<128xf32> to vector<1x128xf32>
    %cst_6 = arith.constant 8.000000e+00 : f32
    %8 = vector.broadcast %cst_6 : f32 to vector<1x128xf32>
    %9 = arith.divf %7, %8 : vector<1x128xf32>
    %10 = arith.mulf %5, %5 : vector<8x128xf32>
    %cst_7 = arith.constant dense<0.000000e+00> : vector<128xf32>
    %11 = vector.multi_reduction <add>, %10, %cst_7 [0] : vector<8x128xf32> to vector<128xf32>
    %12 = vector.shape_cast %11 : vector<128xf32> to vector<1x128xf32>
    %cst_8 = arith.constant 8.000000e+00 : f32
    %13 = vector.broadcast %cst_8 : f32 to vector<1x128xf32>
    %14 = arith.divf %12, %13 : vector<1x128xf32>
    %15 = arith.mulf %9, %9 : vector<1x128xf32>
    %16 = arith.subf %14, %15 : vector<1x128xf32>
    %cst_9 = arith.constant 0.000000e+00 : f32
    %17 = vector.broadcast %cst_9 : f32 to vector<1x128xf32>
    %18 = arith.maximumf %16, %17 : vector<1x128xf32>
    %c0_10 = arith.constant 0 : index
    %c0_11 = arith.constant 0 : index
    %19 = vector.load %arg3[%c0_10, %c0_11] : memref<1x128xf32, #tpu.memory_space<vmem>>, vector<1x128xf32>
    %cst_12 = arith.constant 9.99999974E-6 : f32
    %20 = vector.broadcast %cst_12 : f32 to vector<1x128xf32>
    %21 = arith.addf %18, %20 : vector<1x128xf32>
    %22 = math.rsqrt %21 : vector<1x128xf32>
    %23 = arith.mulf %19, %22 : vector<1x128xf32>
    %c0_13 = arith.constant 0 : index
    %c0_14 = arith.constant 0 : index
    %24 = vector.load %arg4[%c0_13, %c0_14] : memref<1x128xf32, #tpu.memory_space<vmem>>, vector<1x128xf32>
    %25 = arith.mulf %9, %23 : vector<1x128xf32>
    %26 = arith.subf %24, %25 : vector<1x128xf32>
    %27 = vector.broadcast %23 : vector<1x128xf32> to vector<8x128xf32>
    %28 = arith.mulf %5, %27 : vector<8x128xf32>
    %29 = vector.broadcast %26 : vector<1x128xf32> to vector<8x128xf32>
    %30 = arith.addf %28, %29 : vector<8x128xf32>
    %cst_15 = arith.constant 0.000000e+00 : f32
    %31 = vector.broadcast %cst_15 : f32 to vector<8x128xf32>
    %32 = arith.cmpf ogt, %30, %31 : vector<8x128xf32>
    %cst_16 = arith.constant 0.00999999977 : f32
    %33 = vector.broadcast %cst_16 : f32 to vector<8x128xf32>
    %34 = arith.mulf %33, %30 : vector<8x128xf32>
    %35 = arith.select %32, %30, %34 : vector<8x128xi1>, vector<8x128xf32>
    %c0_17 = arith.constant 0 : index
    %c0_18 = arith.constant 0 : index
    %36 = vector.load %arg7[%c0_17, %c0_18] : memref<8x128xf32, #tpu.memory_space<vmem>>, vector<8x128xf32>
    %37 = arith.mulf %35, %36 : vector<8x128xf32>
    %c0_19 = arith.constant 0 : index
    %c0_20 = arith.constant 0 : index
    %38 = vector.load %arg5[%c0_19, %c0_20] : memref<128x256xf32, #tpu.memory_space<vmem>>, vector<128x256xf32>
    %cst_21 = arith.constant dense<0.000000e+00> : vector<8x256xf32>
    %39 = tpu.matmul %37, %38, %cst_21 {dimension_numbers = #tpu.dot_dimension_numbers<[1], [0], [0], [1], [0, 0, 1, 1], [], []>} : vector<8x128xf32>, vector<128x256xf32>, vector<8x256xf32> -> vector<8x256xf32>
    %c0_22 = arith.constant 0 : index
    %c0_23 = arith.constant 0 : index
    %40 = vector.load %arg6[%c0_22, %c0_23] : memref<1x256xf32, #tpu.memory_space<vmem>>, vector<1x256xf32>
    %41 = vector.broadcast %40 : vector<1x256xf32> to vector<8x256xf32>
    %42 = arith.addf %39, %41 : vector<8x256xf32>
    %43 = vector.extract_strided_slice %42 {offsets = [0, 0], sizes = [8, 128], strides = [1, 1]} : vector<8x256xf32> to vector<8x128xf32>
    %44 = vector.extract_strided_slice %42 {offsets = [0, 128], sizes = [8, 128], strides = [1, 1]} : vector<8x256xf32> to vector<8x128xf32>
    %c0_24 = arith.constant 0 : index
    %c0_25 = arith.constant 0 : index
    %45 = vector.load %arg8[%c0_24, %c0_25] : memref<8x128xf32, #tpu.memory_space<vmem>>, vector<8x128xf32>
    %cst_26 = arith.constant 5.000000e-01 : f32
    %46 = vector.broadcast %cst_26 : f32 to vector<8x128xf32>
    %47 = arith.mulf %46, %44 : vector<8x128xf32>
    %48 = math.exp %47 : vector<8x128xf32>
    %49 = arith.mulf %45, %48 : vector<8x128xf32>
    %50 = arith.addf %43, %49 : vector<8x128xf32>
    %c0_27 = arith.constant 0 : index
    %c0_28 = arith.constant 0 : index
    %51 = vector.load %arg9[%c0_27, %c0_28] : memref<8x384xf32, #tpu.memory_space<vmem>>, vector<8x128xf32>
    tpu.vector_store %arg9[%c0_27, %c0_28], %50 {strides = array<i32>} : memref<8x384xf32, #tpu.memory_space<vmem>>, vector<8x128xf32>,
    %c0_29 = arith.constant 0 : index
    %c128 = arith.constant 128 : index
    %52 = vector.load %arg9[%c0_29, %c128] : memref<8x384xf32, #tpu.memory_space<vmem>>, vector<8x128xf32>
    tpu.vector_store %arg9[%c0_29, %c128], %43 {strides = array<i32>} : memref<8x384xf32, #tpu.memory_space<vmem>>, vector<8x128xf32>,
    %c0_30 = arith.constant 0 : index
    %c256 = arith.constant 256 : index
    %53 = vector.load %arg9[%c0_30, %c256] : memref<8x384xf32, #tpu.memory_space<vmem>>, vector<8x128xf32>
    tpu.vector_store %arg9[%c0_30, %c256], %44 {strides = array<i32>} : memref<8x384xf32, #tpu.memory_space<vmem>>, vector<8x128xf32>,
    return
  }
}

</mosaic_0001>

<bundles_post_ra>
// kernel: tpu_custom_call.1
= control target key start
LH: loop header
LB: loop body
LE: loop exit
PB: predicated region body
PF: predicated region fallthrough
CT: control target
= control target key end

     0   :  { %14 = vsyncpa [#allocation3], 0  ;;  %s836_s0 = inlined_call_operand.hbm [shape: f32[8,128], index: 0, kind: input, shape index: {}]   ;;  %s837_s1 = inlined_call_operand.hbm [shape: f32[128,128], index: 1, kind: input, shape index: {}]   ;;  %s838_s2 = inlined_call_operand.hbm [shape: f32[1,128], index: 2, kind: input, shape index: {}]   ;;  %s839_s3 = inlined_call_operand.hbm [shape: f32[1,128], index: 3, kind: input, shape index: {}]   ;;  %s840_s4 = inlined_call_operand.hbm [shape: f32[1,128], index: 4, kind: input, shape index: {}]   ;;  %s841_s5 = inlined_call_operand.hbm [shape: f32[128,256], index: 5, kind: input, shape index: {}]   ;;  %s842_s6 = inlined_call_operand.vmem [shape: f32[1,256], index: 6, kind: input, shape index: {}]   ;;  %s843_s7 = inlined_call_operand.vmem [shape: f32[8,128], index: 7, kind: input, shape index: {}]   ;;  %s844_s8 = inlined_call_operand.vmem [shape: f32[8,128], index: 8, kind: input, shape index: {}]   ;;  %s845_s9 = inlined_call_operand.hbm [shape: f32[8,384], index: 9, kind: output, shape index: {}]  }
   0x1   :  { %15 = vsyncpa [#allocation6], 0 }
   0x2   :  { %16 = vsyncpa [#allocation9], 0 }
   0x3   :  { %17 = vsyncpa [#allocation12], 0 }
   0x4   :  { %18 = vsyncpa [#allocation4], 0  ;;  %s679_s30 = smov [#allocation5]   ;;  %s515_s13 = scalar_lea.hbm %s837_s1, 2048 }
   0x5   :  { %s34_s10 = sshll.u32 %s679_s30, 4  ;;  %p516_p0 = scmp.ne.s32.totalorder %s837_s1, %s515_s13  ;;  %s35_s10 = int_to_ptr.vmem [resolvable:$true] %s34_s10 }
   0x6   :  { %p519_p1 = scmp.lt.u32.totalorder %s515_s13, %s837_s1 }
   0x8   :  { %p521_p2 = pnand %p519_p1, %p516_p0 }
   0xa   :  { %524 = shalt.err (!%p521_p2)
}
   0xb   :  { %s525_s18 = scalar_lea.vmem %s35_s10, 2048  ;;  %p530_p4 = scmp.lt.s32.totalorder %s35_s10, %s35_s10 }
   0xc   :  { %p526_p3 = scmp.ne.s32.totalorder %s35_s10, %s525_s18  ;;  %p531_p5 = scmp.lt.s32.totalorder %s525_s18, %s525_s18 }
   0xe   :  { %p532_p6 = por %p531_p5, %p530_p4 }
  0x10   :  { %p533_p7 = pnand %p532_p6, %p526_p3 }
  0x12   :  { %536 = shalt.err (!%p533_p7)
}
  0x13   :  { %s680_s19 = smov 128   ;;  %s681_s20 = smov 8  }
  0x14   :  { %40 = dma.hbm_to_vmem [thread:$0]  %s837_s1, 2048, %s35_s10, [#allocation6], %s680_s19, %s680_s19, %s681_s20  }
  0x15   :  { %s682_s23 = smov [#allocation8]   ;;  %s683_s25 = smov [#allocation2]  }
  0x16   :  { %s57_s24 = sshll.u32 %s682_s23, 4  ;;  %s25_s26 = sshll.u32 %s683_s25, 4  ;;  %s58_s24 = int_to_ptr.vmem [resolvable:$true] %s57_s24  ;;  %s26_s26 = int_to_ptr.vmem [resolvable:$true] %s25_s26 }
  0x17   :  { %s537_s29 = scalar_lea.hbm %s839_s3, 16 }
  0x18   :  { %p538_p8 = scmp.ne.s32.totalorder %s839_s3, %s537_s29  ;;  %p541_p9 = scmp.lt.u32.totalorder %s537_s29, %s839_s3 }
  0x1a   :  { %p543_p10 = pnand %p541_p9, %p538_p8 }
  0x1c   :  { %546 = shalt.err (!%p543_p10)
}
  0x1d   :  { %s547_s1 = scalar_lea.vmem %s58_s24, 16  ;;  %s551_s10 = scalar_lea.vmem %s58_s24, 32 }
  0x1e   :  { %p548_p11 = scmp.ne.s32.totalorder %s58_s24, %s547_s1  ;;  %p552_p12 = scmp.lt.s32.totalorder %s58_s24, %s58_s24 }
  0x1f   :  { %p553_p13 = scmp.lt.s32.totalorder %s551_s10, %s547_s1 }
  0x21   :  { %p554_p0 = por %p553_p13, %p552_p12 }
  0x23   :  { %p555_p1 = pnand %p554_p0, %p548_p11 }
  0x25   :  { %558 = shalt.err (!%p555_p1)
}
  0x26   :  { %60 = dma.hbm_to_vmem [thread:$0]  %s839_s3, 16, %s58_s24, [#allocation9]  }
  0x27   :  { %s559_s18 = scalar_lea.hbm %s836_s0, 128 }
  0x28   :  { %p560_p2 = scmp.ne.s32.totalorder %s836_s0, %s559_s18  ;;  %p563_p3 = scmp.lt.u32.totalorder %s559_s18, %s836_s0 }
  0x2a   :  { %p565_p4 = pnand %p563_p3, %p560_p2 }
  0x2c   :  { %568 = shalt.err (!%p565_p4)
}
  0x2d   :  { %s569_s23 = scalar_lea.vmem %s26_s26, 128  ;;  %p574_p6 = scmp.lt.s32.totalorder %s26_s26, %s26_s26 }
  0x2e   :  { %p570_p5 = scmp.ne.s32.totalorder %s26_s26, %s569_s23  ;;  %p575_p7 = scmp.lt.s32.totalorder %s569_s23, %s569_s23 }
  0x30   :  { %p576_p8 = por %p575_p7, %p574_p6 }
  0x32   :  { %p577_p9 = pnand %p576_p8, %p570_p5 }
  0x34   :  { %580 = shalt.err (!%p577_p9)
}
  0x35   :  { %28 = dma.hbm_to_vmem [thread:$0]  %s836_s0, 128, %s26_s26, [#allocation3]  }
  0x36   :  { %s684_s25 = smov [#allocation7]   ;;  %s685_s28 = smov [#allocation10]  }
  0x37   :  { %s47_s27 = sshll.u32 %s684_s25, 4  ;;  %s67_s29 = sshll.u32 %s685_s28, 4  ;;  %s48_s27 = int_to_ptr.vmem [resolvable:$true] %s47_s27  ;;  %s68_s29 = int_to_ptr.vmem [resolvable:$true] %s67_s29 }
  0x38   :  { %s581_s12 = scalar_lea.hbm %s838_s2, 16 }
  0x39   :  { %p582_p10 = scmp.ne.s32.totalorder %s838_s2, %s581_s12  ;;  %p585_p11 = scmp.lt.u32.totalorder %s581_s12, %s838_s2 }
  0x3b   :  { %p587_p12 = pnand %p585_p11, %p582_p10 }
  0x3d   :  { %590 = shalt.err (!%p587_p12)
}
  0x3e   :  { %s591_s0 = scalar_lea.vmem %s48_s27, 16  ;;  %s595_s26 = scalar_lea.vmem %s48_s27, 32 }
  0x3f   :  { %p592_p13 = scmp.ne.s32.totalorder %s48_s27, %s591_s0  ;;  %p596_p0 = scmp.lt.s32.totalorder %s48_s27, %s48_s27 }
  0x40   :  { %p597_p1 = scmp.lt.s32.totalorder %s595_s26, %s591_s0 }
  0x42   :  { %p598_p2 = por %p597_p1, %p596_p0 }
  0x44   :  { %p599_p3 = pnand %p598_p2, %p592_p13 }
  0x46   :  { %602 = shalt.err (!%p599_p3)
}
  0x47   :  { %50 = dma.hbm_to_vmem [thread:$0]  %s838_s2, 16, %s48_s27, [#allocation6]  }
  0x48   :  { %s603_s19 = scalar_lea.hbm %s840_s4, 16 }
  0x49   :  { %p604_p4 = scmp.ne.s32.totalorder %s840_s4, %s603_s19  ;;  %p607_p5 = scmp.lt.u32.totalorder %s603_s19, %s840_s4 }
  0x4b   :  { %p609_p6 = pnand %p607_p5, %p604_p4 }
  0x4d   :  { %612 = shalt.err (!%p609_p6)
}
  0x4e   :  { %s613_s3 = scalar_lea.vmem %s68_s29, 16  ;;  %s617_s24 = scalar_lea.vmem %s68_s29, 32 }
  0x4f   :  { %p614_p7 = scmp.ne.s32.totalorder %s68_s29, %s613_s3  ;;  %p618_p8 = scmp.lt.s32.totalorder %s68_s29, %s68_s29 }
  0x50   :  { %p619_p9 = scmp.lt.s32.totalorder %s617_s24, %s613_s3 }
  0x52   :  { %p620_p10 = por %p619_p9, %p618_p8 }
  0x54   :  { %p621_p11 = pnand %p620_p10, %p614_p7 }
  0x56   :  { %624 = shalt.err (!%p621_p11)
}
  0x57   :  { %70 = dma.hbm_to_vmem [thread:$0]  %s840_s4, 16, %s68_s29, [#allocation9]  }
  0x58   :  { %s686_s27 = smov [#allocation11]   ;;  %s625_s12 = scalar_lea.hbm %s841_s5, 4096 }
  0x59   :  { %s76_s28 = sshll.u32 %s686_s27, 4  ;;  %p626_p12 = scmp.ne.s32.totalorder %s841_s5, %s625_s12  ;;  %s77_s28 = int_to_ptr.vmem [resolvable:$true] %s76_s28 }
  0x5a   :  { %p629_p13 = scmp.lt.u32.totalorder %s625_s12, %s841_s5 }
  0x5c   :  { %p631_p0 = pnand %p629_p13, %p626_p12 }
  0x5e   :  { %634 = shalt.err (!%p631_p0)
}
  0x5f   :  { %s635_s0 = scalar_lea.vmem %s77_s28, 4096  ;;  %p640_p2 = scmp.lt.s32.totalorder %s77_s28, %s77_s28 }
  0x60   :  { %p636_p1 = scmp.ne.s32.totalorder %s77_s28, %s635_s0  ;;  %p641_p3 = scmp.lt.s32.totalorder %s635_s0, %s635_s0 }
  0x62   :  { %p642_p4 = por %p641_p3, %p640_p2 }
  0x64   :  { %p643_p5 = pnand %p642_p4, %p636_p1 }
  0x66   :  { %646 = shalt.err (!%p643_p5)
}
  0x67   :  { %s687_s4 = smov 256   ;;  %s688_s29 = smov 16  }
  0x68   :  { %82 = dma.hbm_to_vmem [thread:$0]  %s841_s5, 4096, %s77_s28, [#allocation12], %s687_s4, %s687_s4, %s688_s29  }
  0x69   :  { %669 = dma.done.wait [#allocation3], 128  }
  0x6a   :  { %670 = vsyncadd [#allocation3], 4294967168 }
  0x6b   :  { %671 = dma.done.wait [#allocation6], 2064  }
  0x6c   :  { %672 = vsyncadd [#allocation6], 4294965232 }
  0x6d   :  { %673 = dma.done.wait [#allocation9], 32  }
  0x6e   :  { %674 = vsyncadd [#allocation9], 4294967264 }
  0x6f   :  { %675 = dma.done.wait [#allocation12], 4096  }
  0x70   :  { %676 = vsyncadd [#allocation12], 4294963200  ;;  %v689_v0 = vmov 0.0|0.0   ;;  %vm690_vm0 = vmmov 0   ;;  %v691_v1 = vmov 0.0   ;;  %v108_v2 = vld [vmem:[#allocation5] sm:$0xff] }
  0x71   :  { %441 = vmatprep.subr.bf16.mxu0 %v689_v0  ;;  %438 = vmatprep.mubr.msk.f32.mxu0 %vm690_vm0, %v691_v1  ;;  %v109_v3 = vld [vmem:[#allocation5 + $0x8] sm:$0xff]  ;;  %v110_v4 = vld [vmem:[#allocation5 + $0x10] sm:$0xff]  ;;  %v111_v6 = vld [vmem:[#allocation5 + $0x18] sm:$0xff]  ;;  %s692_s20 = smov [#allocation13]  }
  0x72   :  { %354 = vmatprep.mubr.f32.mxu1 %v691_v1  ;;  %v442_v5 = vpack.c.bf16 %v109_v3, %v108_v2  ;;  %v445_v7 = vpack.c.bf16 %v111_v6, %v110_v4  ;;  %v112_v8 = vld [vmem:[#allocation5 + $0x20] sm:$0xff]  ;;  %v113_v9 = vld [vmem:[#allocation5 + $0x28] sm:$0xff]  ;;  %v114_v11 = vld [vmem:[#allocation5 + $0x30] sm:$0xff]  ;;  %s376_s21 = sshll.u32 %s692_s20, 4  ;;  %s377_s21 = int_to_ptr.vmem [resolvable:$true] %s376_s21 }
  0x73   :  { %v448_v10 = vpack.c.bf16 %v113_v9, %v112_v8  ;;  %v115_v12 = vld [vmem:[#allocation5 + $0x38] sm:$0xff]  ;;  %v116_v14 = vld [vmem:[#allocation5 + $0x40] sm:$0xff]  ;;  %v117_v15 = vld [vmem:[#allocation5 + $0x48] sm:$0xff]  ;;  %p652_p7 = scmp.lt.s32.totalorder %s377_s21, %s377_s21 }
  0x74   :  { %443 = vmatpush3.bf16.msra.mxu0 %v442_v5  ;;  %v451_v13 = vpack.c.bf16 %v115_v12, %v114_v11  ;;  %v454_v16 = vpack.c.bf16 %v117_v15, %v116_v14  ;;  %v118_v17 = vld [vmem:[#allocation5 + $0x50] sm:$0xff]  ;;  %v119_v18 = vld [vmem:[#allocation5 + $0x58] sm:$0xff]  ;;  %v120_v20 = vld [vmem:[#allocation5 + $0x60] sm:$0xff] }
  0x75   :  { %444 = vmatprep.subr.bf16.mxu0 %v689_v0  ;;  %v457_v19 = vpack.c.bf16 %v119_v18, %v118_v17  ;;  %v121_v21 = vld [vmem:[#allocation5 + $0x68] sm:$0xff]  ;;  %v122_v23 = vld [vmem:[#allocation5 + $0x70] sm:$0xff]  ;;  %v123_v24 = vld [vmem:[#allocation5 + $0x78] sm:$0xff] }
  0x76   :  { %v460_v22 = vpack.c.bf16 %v121_v21, %v120_v20  ;;  %v463_v25 = vpack.c.bf16 %v123_v24, %v122_v23  ;;  %v107_v26 = vld [vmem:[#allocation2] sm:$0xff]  ;;  %v247_v27 = vld [vmem:[#allocation11 + $0x8] sm:$0xff]  ;;  %v246_v30 = vld [vmem:[#allocation11] sm:$0xff] }
  0x77   :  { %v249_v28 = vld [vmem:[#allocation11 + $0x18] sm:$0xff]  ;;  %v248_v31 = vld [vmem:[#allocation11 + $0x10] sm:$0xff]  ;;  %v251_v33 = vld [vmem:[#allocation11 + $0x28] sm:$0xff] }
  0x78   :  { %446 = vmatpush3.bf16.msra.mxu0 %v445_v7  ;;  %v465_v29 = vpack.c.bf16 %v249_v28, %v247_v27  ;;  %v467_v32 = vpack.c.bf16 %v248_v31, %v246_v30  ;;  %v253_v34 = vld [vmem:[#allocation11 + $0x38] sm:$0xff]  ;;  %v250_v36 = vld [vmem:[#allocation11 + $0x20] sm:$0xff]  ;;  %v252_v37 = vld [vmem:[#allocation11 + $0x30] sm:$0xff] }
  0x79   :  { %447 = vmatprep.subr.bf16.mxu0 %v689_v0  ;;  %v469_v35 = vpack.c.bf16 %v253_v34, %v251_v33  ;;  %v471_v38 = vpack.c.bf16 %v252_v37, %v250_v36  ;;  %v255_v39 = vld [vmem:[#allocation11 + $0x48] sm:$0xff]  ;;  %v257_v40 = vld [vmem:[#allocation11 + $0x58] sm:$0xff]  ;;  %v254_v42 = vld [vmem:[#allocation11 + $0x40] sm:$0xff]  ;;  %v228_v34 = vlaneseq }
  0x7a   :  { %466 = vmatprep.subr.bf16.mxu1 %v465_v29  ;;  %v473_v41 = vpack.c.bf16 %v257_v40, %v255_v39  ;;  %v256_v43 = vld [vmem:[#allocation11 + $0x50] sm:$0xff]  ;;  %v259_v45 = vld [vmem:[#allocation11 + $0x68] sm:$0xff]  ;;  %v261_v46 = vld [vmem:[#allocation11 + $0x78] sm:$0xff] }
  0x7b   :  { %468 = vmatpush1.bf16.msra.mxu1 %v467_v32  ;;  %v475_v44 = vpack.c.bf16 %v256_v43, %v254_v42  ;;  %v477_v47 = vpack.c.bf16 %v261_v46, %v259_v45  ;;  %v258_v48 = vld [vmem:[#allocation11 + $0x60] sm:$0xff]  ;;  %v260_v49 = vld [vmem:[#allocation11 + $0x70] sm:$0xff]  ;;  %v263_v51 = vld [vmem:[#allocation11 + $0x88] sm:$0xff] }
  0x7c   :  { %449 = vmatpush3.bf16.msra.mxu0 %v448_v10  ;;  %470 = vmatprep.subr.bf16.mxu1 %v469_v35  ;;  %v479_v50 = vpack.c.bf16 %v260_v49, %v258_v48  ;;  %v265_v52 = vld [vmem:[#allocation11 + $0x98] sm:$0xff]  ;;  %v262_v54 = vld [vmem:[#allocation11 + $0x80] sm:$0xff]  ;;  %v264_v55 = vld [vmem:[#allocation11 + $0x90] sm:$0xff]  ;;  %v229_v35 = vshrl.u32 %v228_v34, 7 }
  0x7d   :  { %450 = vmatprep.subr.bf16.mxu0 %v689_v0  ;;  %v481_v53 = vpack.c.bf16 %v265_v52, %v263_v51  ;;  %v483_v56 = vpack.c.bf16 %v264_v55, %v262_v54  ;;  %v267_v57 = vld [vmem:[#allocation11 + $0xa8] sm:$0xff]  ;;  %v269_v58 = vld [vmem:[#allocation11 + $0xb8] sm:$0xff]  ;;  %v266_v60 = vld [vmem:[#allocation11 + $0xa0] sm:$0xff] }
  0x7e   :  { %v485_v59 = vpack.c.bf16 %v269_v58, %v267_v57  ;;  %v268_v61 = vld [vmem:[#allocation11 + $0xb0] sm:$0xff]  ;;  %v271_v63 = vld [vmem:[#allocation11 + $0xc8] sm:$0xff]  ;;  %v270_v1 = vld [vmem:[#allocation11 + $0xc0] sm:$0xff]  ;;  %v230_v37 = vsub.s32 0, %v229_v35  ;;  %v286_v52 = vsub.s32 1, %v229_v35 }
  0x7f   :  { %472 = vmatpush1.bf16.msra.mxu1 %v471_v38  ;;  %v487_v62 = vpack.c.bf16 %v268_v61, %v266_v60  ;;  %v272_v3 = vld [vmem:[#allocation11 + $0xd0] sm:$0xff]  ;;  %v275_v4 = vld [vmem:[#allocation11 + $0xe8] sm:$0xff]  ;;  %v277_v5 = vld [vmem:[#allocation11 + $0xf8] sm:$0xff] }
  0x80   :  { %452 = vmatpush3.bf16.msra.mxu0 %v451_v13  ;;  %474 = vmatprep.subr.bf16.mxu1 %v473_v41  ;;  %v491_v6 = vpack.c.bf16 %v272_v3, %v270_v1  ;;  %v493_v7 = vpack.c.bf16 %v277_v5, %v275_v4  ;;  %v274_v8 = vld [vmem:[#allocation11 + $0xe0] sm:$0xff]  ;;  %v276_v9 = vld [vmem:[#allocation11 + $0xf0] sm:$0xff]  ;;  %v388_v11 = vld [vmem:[#allocation7] ss:$0 sm:$0xff] }
  0x81   :  { %453 = vmatprep.subr.bf16.mxu0 %v689_v0  ;;  %v495_v10 = vpack.c.bf16 %v276_v9, %v274_v8  ;;  %v220_v36 = vld [vmem:[#allocation8] sm:$0x1]  ;;  %v224_v40 = vld [vmem:[#allocation10] sm:$0x1]  ;;  %v244_v48 = vld [vmem:[%s843_s7] sm:$0xff] }
  0x82   :  { %v278_v51 = vld [vmem:[%s842_s6] sm:$0x3]  ;;  %s647_s6 = scalar_lea.vmem %s377_s21, 384 }
  0x83   :  { %476 = vmatpush1.bf16.msra.mxu1 %v475_v44  ;;  %v287_v54 = vrot.slane %v278_v51, %v286_v52  ;;  %v361_v61 = vld [vmem:[%s844_s8] sm:$0xff]  ;;  %p648_p6 = scmp.ne.s32.totalorder %s377_s21, %s647_s6  ;;  %p653_p8 = scmp.lt.s32.totalorder %s647_s6, %s647_s6 }
  0x84   :  { %455 = vmatpush3.bf16.msra.mxu0 %v454_v16  ;;  %478 = vmatprep.subr.bf16.mxu1 %v477_v47 }
  0x85   :  { %456 = vmatprep.subr.bf16.mxu0 %v689_v0  ;;  %p654_p9 = por %p653_p8, %p652_p7 }
  0x87   :  { %480 = vmatpush1.bf16.msra.mxu1 %v479_v50  ;;  %p655_p10 = pnand %p654_p9, %p648_p6 }
  0x88   :  { %458 = vmatpush3.bf16.msra.mxu0 %v457_v19  ;;  %482 = vmatprep.subr.bf16.mxu1 %v481_v53  ;;  %v283_v53 = vrot.slane %v278_v51, %v230_v37 }
  0x89   :  { %459 = vmatprep.subr.bf16.mxu0 %v689_v0 }
  0x8b   :  { %484 = vmatpush1.bf16.msra.mxu1 %v483_v56 }
  0x8c   :  { %461 = vmatpush3.bf16.msra.mxu0 %v460_v22  ;;  %486 = vmatprep.subr.bf16.mxu1 %v485_v59 }
  0x8d   :  { %462 = vmatprep.subr.bf16.mxu0 %v689_v0  ;;  %v273_v0 = vld [vmem:[#allocation11 + $0xd8] sm:$0xff] }
  0x8e   :  { %v489_v2 = vpack.c.bf16 %v273_v0, %v271_v63 }
  0x8f   :  { %488 = vmatpush1.bf16.msra.mxu1 %v487_v62 }
  0x90   :  { %464 = vmatpush3.bf16.msra.mxu0 %v463_v25  ;;  %490 = vmatprep.subr.bf16.mxu1 %v489_v2 }
  0x93   :  { %439 = vmatmul.mubr.f32.vlgmr.msra.gmra.mrb[0].mxu0 %v107_v26  ;;  %492 = vmatpush1.bf16.msra.mxu1 %v491_v6 }
  0x94   :  { %494 = vmatprep.subr.bf16.mxu1 %v493_v7 }
  0x97   :  { %496 = vmatpush1.bf16.msra.mxu1 %v495_v10 }
 0x166   :  { %v197_v12 = vpop.f32.mrb[0].mxu0 }
 0x167   :  { %v198_v13 = vadd.f32 %v388_v11, %v197_v12  ;;  %v440_v14 = vpop.f32.mrb[1].mxu0 }
 0x169   :  { %v201_v15 = vrot.slane %v198_v13, 4  ;;  %v209_v16 = vmul.f32 %v198_v13, %v198_v13 }
 0x16b   :  { %v202_v17 = vadd.f32 %v201_v15, %v198_v13  ;;  %v210_v18 = vrot.slane %v209_v16, 4 }
 0x16d   :  { %v203_v19 = vrot.slane %v202_v17, 2  ;;  %v211_v20 = vadd.f32 %v210_v18, %v209_v16 }
 0x16f   :  { %v204_v21 = vadd.f32 %v203_v19, %v202_v17  ;;  %v212_v22 = vrot.slane %v211_v20, 2 }
 0x171   :  { %v205_v23 = vrot.slane %v204_v21, 1  ;;  %v213_v24 = vadd.f32 %v212_v22, %v211_v20 }
 0x173   :  { %v206_v25 = vadd.f32 %v205_v23, %v204_v21  ;;  %v214_v26 = vrot.slane %v213_v24, 1 }
 0x175   :  { %v208_v27 = vmul.f32 0.125, %v206_v25  ;;  %v215_v28 = vadd.f32 %v214_v26, %v213_v24 }
 0x177   :  { %v216_v29 = vmul.f32 0.125, %v215_v28  ;;  %v217_v30 = vmul.f32 %v208_v27, %v208_v27 }
 0x179   :  { %v218_v31 = vsub.f32 %v216_v29, %v217_v30 }
 0x17b   :  { %v219_v32 = vmax.f32 %v218_v31, 0.0 }
 0x17d   :  { %v221_v33 = vadd.f32 1e-05, %v219_v32 }
 0x17f   :  { %511 = vrsqrt.f32 %v221_v33 }
 0x189   :  { %v512_v38 = vpop.eup %511 }
 0x18a   :  { %v223_v39 = vmul.f32 %v512_v38, %v220_v36 }
 0x18c   :  { %v225_v41 = vmul.f32 %v223_v39, %v208_v27  ;;  %v231_v42 = vrot.slane %v223_v39, %v230_v37 }
 0x18e   :  { %v226_v43 = vsub.f32 %v224_v40, %v225_v41  ;;  %v233_v44 = vmul.f32 %v231_v42, %v198_v13 }
 0x190   :  { %v238_v45 = vrot.slane %v226_v43, %v230_v37 }
 0x192   :  { %v240_v46 = vadd.f32 %v238_v45, %v233_v44 }
 0x194   :  { %vm241_vm1 = vcmp.gt.f32.partialorder %v240_v46, 0.0  ;;  %v242_v47 = vmul.f32 0.01, %v240_v46 }
 0x196   :  { %v243_v49 = vsel %vm241_vm1, %v240_v46, %v242_v47 }
 0x197   :  { %v245_v50 = vmul.f32 %v244_v48, %v243_v49 }
 0x199   :  { %355 = vmatmul.mubr.f32.vlgmr.msra.gmra.mrb[0].mxu1 %v245_v50 }
 0x26c   :  { %v356_v55 = vpop.f32.mrb[0].mxu1 }
 0x26d   :  { %v357_v56 = vadd.f32 %v356_v55, %v283_v53  ;;  %v358_v57 = vpop.f32.mrb[1].mxu1 }
 0x26e   :  { %v359_v58 = vadd.f32 %v358_v57, %v287_v54 }
 0x26f   :  { %368 = vst [vmem:[#allocation13 + $0x8] sm:$0xff] %v357_v56 }
 0x270   :  { %v362_v59 = vmul.f32 0.5, %v359_v58  ;;  %369 = vst [vmem:[#allocation13 + $0x10] sm:$0xff] %v359_v58 }
 0x272   :  { %v363_v60 = vmul.f32 1.442695, %v362_v59 }
 0x274   :  { %513 = vpow2.f32 %v363_v60 }
 0x27e   :  { %v514_v62 = vpop.eup %513 }
 0x27f   :  { %v365_v63 = vmul.f32 %v514_v62, %v361_v61 }
 0x281   :  { %v366_v0 = vadd.f32 %v365_v63, %v357_v56 }
 0x283   :  { %367 = vst [vmem:[#allocation13] sm:$0xff] %v366_v0 }
 0x284   :  { %658 = shalt.err (!%p655_p10)
}
 0x285   :  { %s659_s3 = scalar_lea.hbm %s845_s9, 384 }
 0x286   :  { %p660_p11 = scmp.ne.s32.totalorder %s845_s9, %s659_s3  ;;  %p663_p12 = scmp.lt.u32.totalorder %s659_s3, %s845_s9 }
 0x288   :  { %p665_p13 = pnand %p663_p12, %p660_p11 }
 0x28a   :  { %668 = shalt.err (!%p665_p13)
}
 0x28b   :  { %379 = dma.vmem_to_hbm [thread:$0]  %s377_s21, 384, %s845_s9, [#allocation4]  }
 0x28c   :  { %677 = dma.done.wait [#allocation4], 384  }
 0x28d   :  { %678 = vsyncadd [#allocation4], 4294966912 }
 0x28e   :  { %383 = vsyncpa [#allocation3], 1 }
 0x28f   :  { %384 = vsyncpa [#allocation6], 1 }
 0x290   :  { %385 = vsyncpa [#allocation9], 1 }
 0x291   :  { %386 = vsyncpa [#allocation12], 1 }
 0x292   :  { %387 = vsyncpa [#allocation4], 1 }

</bundles_post_ra>
